<compile_context>
chip_gen: v6e
topology: v6e:2x2x1
jax: 0.10.0
libtpu: 0.0.40
codegen_flags: <defaults>
</compile_context>

<pallas_src>
import functools
import math

import jax
import jax.numpy as jnp
from jax import lax
from jax.experimental import pallas as pl
from jax.experimental.pallas import tpu as pltpu


def _round_up(v, m):
    return ((v + m - 1) // m) * m


_STRIP = 8  # strip height (sublane-aligned)


# ------------------------------- kernel -----------------------------------
def _mdsi_kernel(x_ref, y_ref, o_ref, lx_s, ly_s, re_s, im_s, *,
                 hgt, wid, c1, c2, c3, alpha, beta, gamma, rho, q, o,
                 combination):
    _, _, hp, wp = x_ref.shape          # (1, 3, Hp, Wp), Hp % 8 == 0, Wp % 128 == 0
    sh = _STRIP
    n_strips = hp // sh
    f32 = jnp.float32

    def real_pow(v, p):
        p = float(p)
        if p == 1.0:
            return v
        if p == 0.5:
            return jnp.sqrt(v)
        if p == 0.25:
            return jnp.sqrt(jnp.sqrt(v))
        return jnp.power(v, p)

    def recip(d):
        # EUP approx reciprocal + one Newton-Raphson step (~f32 accuracy).
        r = pl.reciprocal(d, approx=True)
        return r * (2.0 - d * r)

    # Trace-time layout facts.
    need_col_mask = wp != wid       # layout pad columns exist (already zero)
    need_wrap_mask = wp == wid      # horizontal roll wraps into valid data
    need_row_mask = hp != hgt       # layout pad rows exist

    # Hoisted iotas / masks (computed once per image, reused by all strips).
    row_ids = lax.broadcasted_iota(jnp.int32, (sh, wp), 0)
    top_row = row_ids == 0
    bot_row = row_ids == sh - 1
    col_valid = lmask = rmask = None
    if need_col_mask or need_wrap_mask:
        col_ids = lax.broadcasted_iota(jnp.int32, (sh, wp), 1)
        if need_col_mask:
            col_valid = (col_ids < wid).astype(f32)
        if need_wrap_mask:
            lmask = (col_ids != 0).astype(f32)
            rmask = (col_ids != wp - 1).astype(f32)

    def strip_mask(r0):
        # 0/1 validity of this strip's pixels w.r.t. the true H x W image.
        if need_row_mask and need_col_mask:
            return jnp.where(row_ids + r0 < hgt, col_valid, 0.0)
        if need_row_mask:
            return (row_ids + r0 < hgt).astype(f32)
        if need_col_mask:
            return col_valid
        return None

    zeros_strip = jnp.zeros((sh, wp), f32)

    # ---- stage A: luminance planes into scratch (with zero halo bands) ----
    # lx_s / ly_s layout: rows [0, 8) zero band, rows [8, 8+Hp) luminance,
    # rows [8+Hp, 16+Hp) zero band.  Layout-pad rows/cols of the input are
    # zero, so lum is already zero there (correct halo values).
    lx_s[pl.ds(0, sh), :] = zeros_strip
    ly_s[pl.ds(0, sh), :] = zeros_strip
    lx_s[pl.ds(sh + hp, sh), :] = zeros_strip
    ly_s[pl.ds(sh + hp, sh), :] = zeros_strip

    def lum_body(s, carry):
        r0 = pl.multiple_of(s * sh, sh)
        src = pl.ds(r0, sh)
        dst = pl.ds(pl.multiple_of(r0 + sh, sh), sh)
        rx = x_ref[0, 0, src, :]
        gx = x_ref[0, 1, src, :]
        bx = x_ref[0, 2, src, :]
        ry = y_ref[0, 0, src, :]
        gy = y_ref[0, 1, src, :]
        by = y_ref[0, 2, src, :]
        lx_s[dst, :] = 0.2989 * rx + 0.587 * gx + 0.114 * bx
        ly_s[dst, :] = 0.2989 * ry + 0.587 * gy + 0.114 * by
        return carry

    lax.fori_loop(0, n_strips, lum_body, 0)

    # ---- stage B: per-strip gradient / chroma similarity -> re, im --------
    def grad(l_ref, off):
        # Separable 3x3 Prewitt (cross-correlation, zero padding) on the
        # aligned strip.  Vertical neighbours come from aligned strip loads
        # of the scratch (+ its zero bands) combined via sublane rolls.
        prev = l_ref[pl.ds(pl.multiple_of(off - sh, sh), sh), :]
        cur = l_ref[pl.ds(off, sh), :]
        nxt = l_ref[pl.ds(pl.multiple_of(off + sh, sh), sh), :]
        up = pltpu.roll(jnp.where(bot_row, prev, cur), 1, 0)        # l(r-1, c)
        dn = pltpu.roll(jnp.where(top_row, nxt, cur), sh - 1, 0)    # l(r+1, c)

        def lf(a):  # a(r, c-1), zero halo on the left edge
            a = pltpu.roll(a, 1, 1)
            return a * lmask if need_wrap_mask else a

        def rt(a):  # a(r, c+1), zero halo on the right edge
            a = pltpu.roll(a, wp - 1, 1)
            return a * rmask if need_wrap_mask else a

        sv = up + cur + dn                  # vertical 3-sum
        dv = up - dn                        # vertical difference
        g0 = (lf(sv) - rt(sv)) * (1.0 / 3.0)
        g1 = (lf(dv) + dv + rt(dv)) * (1.0 / 3.0)
        return g0, g1

    def main_body(s, carry):
        sre, sim = carry
        r0 = pl.multiple_of(s * sh, sh)
        off = pl.multiple_of(r0 + sh, sh)

        # Gradient similarity on the L (luminance) channel.
        g0x, g1x = grad(lx_s, off)
        g0y, g1y = grad(ly_s, off)
        gm_x2 = g0x * g0x + g1x * g1x
        gm_y2 = g0y * g0y + g1y * g1y
        g0a = g0x + g0y
        g1a = g1x + g1y
        gm_a2 = 0.25 * (g0a * g0a + g1a * g1a)   # (|grad(l_x + l_y)| / 2)^2
        gm_x = jnp.sqrt(gm_x2)
        gm_y = jnp.sqrt(gm_y2)
        gm_a = jnp.sqrt(gm_a2)
        gs = ((2.0 * gm_x * gm_y + c1) * recip(gm_x2 + gm_y2 + c1)
              + (2.0 * gm_x * gm_a + c2) * recip(gm_x2 + gm_a2 + c2)
              - (2.0 * gm_y * gm_a + c2) * recip(gm_y2 + gm_a2 + c2))

        # Chromaticity similarity on the H / M channels of LHM.
        src = pl.ds(r0, sh)
        rx = x_ref[0, 0, src, :]
        gx = x_ref[0, 1, src, :]
        bx = x_ref[0, 2, src, :]
        ry = y_ref[0, 0, src, :]
        gy = y_ref[0, 1, src, :]
        by = y_ref[0, 2, src, :]
        hx = 0.30 * rx + 0.04 * gx - 0.35 * bx
        mx = 0.34 * rx - 0.60 * gx + 0.17 * bx
        hy = 0.30 * ry + 0.04 * gy - 0.35 * by
        my = 0.34 * ry - 0.60 * gy + 0.17 * by
        cs = ((2.0 * (hx * hy + mx * my) + c3)
              * recip(hx * hx + mx * mx + hy * hy + my * my + c3))

        m = strip_mask(r0)

        # Complex combination raised to the power q, with real arithmetic
        # (gs, cs are real, so every factor's argument is 0 or pi).  The
        # validity mask is folded once into the magnitude.
        if combination == 'prod':
            mag_q = (real_pow(jnp.abs(gs), gamma * q)
                     * real_pow(jnp.abs(cs), beta * q))
            if m is not None:
                mag_q = mag_q * m
            gneg = gs < 0.0
            cneg = cs < 0.0
            c10, s10 = math.cos(q * gamma * math.pi), math.sin(q * gamma * math.pi)
            c01, s01 = math.cos(q * beta * math.pi), math.sin(q * beta * math.pi)
            c11, s11 = (math.cos(q * (gamma + beta) * math.pi),
                        math.sin(q * (gamma + beta) * math.pi))
            re = mag_q * jnp.where(gneg, jnp.where(cneg, c11, c10),
                                   jnp.where(cneg, c01, 1.0))
            im = mag_q * jnp.where(gneg, jnp.where(cneg, s11, s10),
                                   jnp.where(cneg, s01, 0.0))
        else:  # 'sum' (module default)
            gcs = alpha * gs + (1.0 - alpha) * cs
            mag_q = real_pow(jnp.abs(gcs), q)
            if m is not None:
                mag_q = mag_q * m
            neg = gcs < 0.0
            re = mag_q * jnp.where(neg, math.cos(q * math.pi), 1.0)
            im = mag_q * jnp.where(neg, math.sin(q * math.pi), 0.0)

        re_s[pl.ds(r0, sh), :] = re
        im_s[pl.ds(r0, sh), :] = im
        return sre + jnp.sum(re), sim + jnp.sum(im)

    sre, sim = lax.fori_loop(0, n_strips, main_body,
                             (jnp.zeros((), f32), jnp.zeros((), f32)))

    # ---- stage C: mean-deviation pass --------------------------------------
    inv_hw = 1.0 / float(hgt * wid)
    re_avg = sre * inv_hw
    im_avg = sim * inv_hw

    def dev_body(s, acc):
        r0 = pl.multiple_of(s * sh, sh)
        re = re_s[pl.ds(r0, sh), :]
        im = im_s[pl.ds(r0, sh), :]
        dre = re - re_avg
        dim_ = im - im_avg
        sc = real_pow(jnp.sqrt(dre * dre + dim_ * dim_), rho)
        m = strip_mask(r0)
        if m is not None:
            sc = sc * m
        return acc + jnp.sum(sc)

    ssum = lax.fori_loop(0, n_strips, dev_body, jnp.zeros((), f32))
    mds = real_pow(ssum * inv_hw, o / rho)
    o_ref[...] = jnp.full(o_ref.shape, mds, dtype=f32)


# ------------------------------ wrapper ------------------------------------
def mdsi_pallas(x, y, *, combination='sum', value_range=1.0, downsample=True,
                reduction='mean', c1=140 / 255 ** 2, c2=55 / 255 ** 2,
                c3=550 / 255 ** 2, alpha=0.6, beta=0.1, gamma=0.2,
                rho=1.0, q=0.25, o=0.25):
    """x, y: (N, 3, H, W) float RGB in [0, value_range]. Returns the MDSI."""
    n, c, hgt, wid = x.shape
    assert c == 3
    x = x.astype(jnp.float32)
    y = y.astype(jnp.float32)

    if downsample:
        # piqa downsamples toward ~256px via avg_pool2d(kernel=factor).
        factor = max(1, round(min(hgt, wid) / 256))
        if factor > 1:
            # Exactly matches F.avg_pool2d(..., ceil_mode=True) when divisible.
            # TODO(synk): ceil-mode partial tail windows for non-divisible H/W.
            assert hgt % factor == 0 and wid % factor == 0
            x = x.reshape(n, 3, hgt // factor, factor,
                          wid // factor, factor).mean(axis=(3, 5))
            y = y.reshape(n, 3, hgt // factor, factor,
                          wid // factor, factor).mean(axis=(3, 5))
            hgt //= factor
            wid //= factor

    c1v = c1 * value_range ** 2
    c2v = c2 * value_range ** 2
    c3v = c3 * value_range ** 2

    # Pad only to (8, 128) alignment (no conv halo); zero-fill matches the
    # halo requirement of the in-kernel stencil.
    hp = _round_up(hgt, 8)
    wp = _round_up(wid, 128)
    if (hp, wp) != (hgt, wid):
        pad_cfg = ((0, 0), (0, 0), (0, hp - hgt), (0, wp - wid))
        xp = jnp.pad(x, pad_cfg)
        yp = jnp.pad(y, pad_cfg)
    else:
        xp, yp = x, y

    kernel = functools.partial(
        _mdsi_kernel, hgt=hgt, wid=wid, c1=c1v, c2=c2v, c3=c3v, alpha=alpha,
        beta=beta, gamma=gamma, rho=rho, q=q, o=o, combination=combination)

    cost = pl.CostEstimate(
        flops=int(n * 150 * hp * wp),
        transcendentals=int(n * 12 * hp * wp),
        bytes_accessed=int(n * 2 * 3 * hp * wp * 4),
    )

    out = pl.pallas_call(
        kernel,
        out_shape=jax.ShapeDtypeStruct((n, 1, 128), jnp.float32),
        grid=(n,),
        in_specs=[
            pl.BlockSpec((1, 3, hp, wp), lambda i: (i, 0, 0, 0)),
            pl.BlockSpec((1, 3, hp, wp), lambda i: (i, 0, 0, 0)),
        ],
        out_specs=pl.BlockSpec((1, 1, 128), lambda i: (i, 0, 0)),
        scratch_shapes=[
            pltpu.VMEM((hp + 2 * _STRIP, wp), jnp.float32),  # lum x (+ halo bands)
            pltpu.VMEM((hp + 2 * _STRIP, wp), jnp.float32),  # lum y (+ halo bands)
            pltpu.VMEM((hp, wp), jnp.float32),               # re(gcs^q)
            pltpu.VMEM((hp, wp), jnp.float32),               # im(gcs^q)
        ],
        compiler_params=pltpu.CompilerParams(
            dimension_semantics=("parallel",),
            vmem_limit_bytes=48 * 1024 * 1024,
        ),
        cost_estimate=cost,
    )(xp, yp)

    mds = out[:, 0, 0]
    if reduction == 'mean':
        return jnp.mean(mds)
    if reduction == 'sum':
        return jnp.sum(mds)
    return mds


if __name__ == "__main__":
    key = jax.random.PRNGKey(0)
    kx, ky = jax.random.split(key)
    x = jax.random.uniform(kx, (2, 3, 16, 16), dtype=jnp.float32)
    y = jax.random.uniform(ky, (2, 3, 16, 16), dtype=jnp.float32)
    loss = jax.jit(mdsi_pallas)(x, y)
    jax.block_until_ready(loss)
    print("KERNEL_OK")
</pallas_src>

<mosaic_0001>
module attributes {stable_mosaic.version = 11 : i64} {
  func.func @_mdsi_kernel(%arg0: i32, %arg1: memref<1x3x16x128xf32, #tpu.memory_space<vmem>>, %arg2: memref<1x3x16x128xf32, #tpu.memory_space<vmem>>, %arg3: memref<1x1x128xf32, #tpu.memory_space<vmem>>, %arg4: memref<32x128xf32, #tpu.memory_space<vmem>>, %arg5: memref<32x128xf32, #tpu.memory_space<vmem>>, %arg6: memref<16x128xf32, #tpu.memory_space<vmem>>, %arg7: memref<16x128xf32, #tpu.memory_space<vmem>>) attributes {dimension_semantics = [#tpu.dimension_semantics<parallel>], iteration_bounds = array<i64: 2>, scalar_prefetch = 0 : i64, scratch_operands = 4 : i64, tpu.core_type = #tpu.core_type<tc>, window_params = [{transform_indices = @transform_0, window_bounds = array<i64: 1, 3, 16, 128>}, {transform_indices = @transform_1, window_bounds = array<i64: 1, 3, 16, 128>}, {transform_indices = @transform_2, window_bounds = array<i64: 1, 1, 128>}]} {
    %0 = tpu.iota {dimensions = array<i32: 0>} : vector<8x128xi32>
    %c0_i32 = arith.constant 0 : i32
    %1 = vector.broadcast %c0_i32 : i32 to vector<8x128xi32>
    %2 = arith.cmpi eq, %0, %1 : vector<8x128xi32>
    %c7_i32 = arith.constant 7 : i32
    %3 = vector.broadcast %c7_i32 : i32 to vector<8x128xi32>
    %4 = arith.cmpi eq, %0, %3 : vector<8x128xi32>
    %5 = tpu.iota {dimensions = array<i32: 1>} : vector<8x128xi32>
    %c16_i32 = arith.constant 16 : i32
    %6 = vector.broadcast %c16_i32 : i32 to vector<8x128xi32>
    %7 = arith.cmpi slt, %5, %6 : vector<8x128xi32>
    %8 = arith.extui %7 : vector<8x128xi1> to vector<8x128xi32>
    %9 = arith.sitofp %8 : vector<8x128xi32> to vector<8x128xf32>
    %cst = arith.constant 0.000000e+00 : f32
    %10 = vector.broadcast %cst : f32 to vector<8x128xf32>
    %c0 = arith.constant 0 : index
    %c0_0 = arith.constant 0 : index
    %11 = vector.load %arg4[%c0, %c0_0] : memref<32x128xf32, #tpu.memory_space<vmem>>, vector<8x128xf32>
    tpu.vector_store %arg4[%c0, %c0_0], %10 {strides = array<i32>} : memref<32x128xf32, #tpu.memory_space<vmem>>, vector<8x128xf32>,
    %c0_1 = arith.constant 0 : index
    %c0_2 = arith.constant 0 : index
    %12 = vector.load %arg5[%c0_1, %c0_2] : memref<32x128xf32, #tpu.memory_space<vmem>>, vector<8x128xf32>
    tpu.vector_store %arg5[%c0_1, %c0_2], %10 {strides = array<i32>} : memref<32x128xf32, #tpu.memory_space<vmem>>, vector<8x128xf32>,
    %c24 = arith.constant 24 : index
    %c0_3 = arith.constant 0 : index
    %13 = vector.load %arg4[%c24, %c0_3] : memref<32x128xf32, #tpu.memory_space<vmem>>, vector<8x128xf32>
    tpu.vector_store %arg4[%c24, %c0_3], %10 {strides = array<i32>} : memref<32x128xf32, #tpu.memory_space<vmem>>, vector<8x128xf32>,
    %c24_4 = arith.constant 24 : index
    %c0_5 = arith.constant 0 : index
    %14 = vector.load %arg5[%c24_4, %c0_5] : memref<32x128xf32, #tpu.memory_space<vmem>>, vector<8x128xf32>
    tpu.vector_store %arg5[%c24_4, %c0_5], %10 {strides = array<i32>} : memref<32x128xf32, #tpu.memory_space<vmem>>, vector<8x128xf32>,
    %c0_i32_6 = arith.constant 0 : i32
    %c2_i32 = arith.constant 2 : i32
    %15 = arith.addi %c0_i32_6, %c2_i32 : i32
    %c1_i32 = arith.constant 1 : i32
    scf.for %arg8 = %c0_i32_6 to %15 step %c1_i32  : i32 {
      %c8_i32 = arith.constant 8 : i32
      %27 = arith.muli %arg8, %c8_i32 : i32
      %28 = tpu.assume_multiple %27, 8 : i32
      %c8_i32_25 = arith.constant 8 : i32
      %29 = arith.addi %28, %c8_i32_25 : i32
      %30 = tpu.assume_multiple %29, 8 : i32
      %c0_26 = arith.constant 0 : index
      %c0_27 = arith.constant 0 : index
      %31 = arith.index_cast %28 : i32 to index
      %c0_28 = arith.constant 0 : index
      %32 = vector.load %arg1[%c0_26, %c0_27, %31, %c0_28] : memref<1x3x16x128xf32, #tpu.memory_space<vmem>>, vector<1x1x8x128xf32>
      %33 = vector.shape_cast %32 : vector<1x1x8x128xf32> to vector<8x128xf32>
      %c0_29 = arith.constant 0 : index
      %c1 = arith.constant 1 : index
      %34 = arith.index_cast %28 : i32 to index
      %c0_30 = arith.constant 0 : index
      %35 = vector.load %arg1[%c0_29, %c1, %34, %c0_30] : memref<1x3x16x128xf32, #tpu.memory_space<vmem>>, vector<1x1x8x128xf32>
      %36 = vector.shape_cast %35 : vector<1x1x8x128xf32> to vector<8x128xf32>
      %c0_31 = arith.constant 0 : index
      %c2 = arith.constant 2 : index
      %37 = arith.index_cast %28 : i32 to index
      %c0_32 = arith.constant 0 : index
      %38 = vector.load %arg1[%c0_31, %c2, %37, %c0_32] : memref<1x3x16x128xf32, #tpu.memory_space<vmem>>, vector<1x1x8x128xf32>
      %39 = vector.shape_cast %38 : vector<1x1x8x128xf32> to vector<8x128xf32>
      %c0_33 = arith.constant 0 : index
      %c0_34 = arith.constant 0 : index
      %40 = arith.index_cast %28 : i32 to index
      %c0_35 = arith.constant 0 : index
      %41 = vector.load %arg2[%c0_33, %c0_34, %40, %c0_35] : memref<1x3x16x128xf32, #tpu.memory_space<vmem>>, vector<1x1x8x128xf32>
      %42 = vector.shape_cast %41 : vector<1x1x8x128xf32> to vector<8x128xf32>
      %c0_36 = arith.constant 0 : index
      %c1_37 = arith.constant 1 : index
      %43 = arith.index_cast %28 : i32 to index
      %c0_38 = arith.constant 0 : index
      %44 = vector.load %arg2[%c0_36, %c1_37, %43, %c0_38] : memref<1x3x16x128xf32, #tpu.memory_space<vmem>>, vector<1x1x8x128xf32>
      %45 = vector.shape_cast %44 : vector<1x1x8x128xf32> to vector<8x128xf32>
      %c0_39 = arith.constant 0 : index
      %c2_40 = arith.constant 2 : index
      %46 = arith.index_cast %28 : i32 to index
      %c0_41 = arith.constant 0 : index
      %47 = vector.load %arg2[%c0_39, %c2_40, %46, %c0_41] : memref<1x3x16x128xf32, #tpu.memory_space<vmem>>, vector<1x1x8x128xf32>
      %48 = vector.shape_cast %47 : vector<1x1x8x128xf32> to vector<8x128xf32>
      %cst_42 = arith.constant 2.989000e-01 : f32
      %49 = vector.broadcast %cst_42 : f32 to vector<8x128xf32>
      %50 = arith.mulf %49, %33 : vector<8x128xf32>
      %cst_43 = arith.constant 5.870000e-01 : f32
      %51 = vector.broadcast %cst_43 : f32 to vector<8x128xf32>
      %52 = arith.mulf %51, %36 : vector<8x128xf32>
      %53 = arith.addf %50, %52 : vector<8x128xf32>
      %cst_44 = arith.constant 1.140000e-01 : f32
      %54 = vector.broadcast %cst_44 : f32 to vector<8x128xf32>
      %55 = arith.mulf %54, %39 : vector<8x128xf32>
      %56 = arith.addf %53, %55 : vector<8x128xf32>
      %57 = arith.index_cast %30 : i32 to index
      %c0_45 = arith.constant 0 : index
      %58 = vector.load %arg4[%57, %c0_45] : memref<32x128xf32, #tpu.memory_space<vmem>>, vector<8x128xf32>
      tpu.vector_store %arg4[%57, %c0_45], %56 {strides = array<i32>} : memref<32x128xf32, #tpu.memory_space<vmem>>, vector<8x128xf32>,
      %cst_46 = arith.constant 2.989000e-01 : f32
      %59 = vector.broadcast %cst_46 : f32 to vector<8x128xf32>
      %60 = arith.mulf %59, %42 : vector<8x128xf32>
      %cst_47 = arith.constant 5.870000e-01 : f32
      %61 = vector.broadcast %cst_47 : f32 to vector<8x128xf32>
      %62 = arith.mulf %61, %45 : vector<8x128xf32>
      %63 = arith.addf %60, %62 : vector<8x128xf32>
      %cst_48 = arith.constant 1.140000e-01 : f32
      %64 = vector.broadcast %cst_48 : f32 to vector<8x128xf32>
      %65 = arith.mulf %64, %48 : vector<8x128xf32>
      %66 = arith.addf %63, %65 : vector<8x128xf32>
      %67 = arith.index_cast %30 : i32 to index
      %c0_49 = arith.constant 0 : index
      %68 = vector.load %arg5[%67, %c0_49] : memref<32x128xf32, #tpu.memory_space<vmem>>, vector<8x128xf32>
      tpu.vector_store %arg5[%67, %c0_49], %66 {strides = array<i32>} : memref<32x128xf32, #tpu.memory_space<vmem>>, vector<8x128xf32>,
    }
    %c2_i32_7 = arith.constant 2 : i32
    %cst_8 = arith.constant 0.000000e+00 : f32
    %cst_9 = arith.constant 0.000000e+00 : f32
    %c0_i32_10 = arith.constant 0 : i32
    %c2_i32_11 = arith.constant 2 : i32
    %16 = arith.addi %c0_i32_10, %c2_i32_11 : i32
    %c1_i32_12 = arith.constant 1 : i32
    %17:2 = scf.for %arg8 = %c0_i32_10 to %16 step %c1_i32_12 iter_args(%arg9 = %cst_8, %arg10 = %cst_9) -> (f32, f32)  : i32 {
      %c8_i32 = arith.constant 8 : i32
      %27 = arith.muli %arg8, %c8_i32 : i32
      %28 = tpu.assume_multiple %27, 8 : i32
      %c8_i32_25 = arith.constant 8 : i32
      %29 = arith.addi %28, %c8_i32_25 : i32
      %30 = tpu.assume_multiple %29, 8 : i32
      %c8_i32_26 = arith.constant 8 : i32
      %31 = arith.subi %30, %c8_i32_26 : i32
      %32 = tpu.assume_multiple %31, 8 : i32
      %33 = arith.index_cast %32 : i32 to index
      %c0_27 = arith.constant 0 : index
      %34 = vector.load %arg4[%33, %c0_27] : memref<32x128xf32, #tpu.memory_space<vmem>>, vector<8x128xf32>
      %35 = arith.index_cast %30 : i32 to index
      %c0_28 = arith.constant 0 : index
      %36 = vector.load %arg4[%35, %c0_28] : memref<32x128xf32, #tpu.memory_space<vmem>>, vector<8x128xf32>
      %c8_i32_29 = arith.constant 8 : i32
      %37 = arith.addi %30, %c8_i32_29 : i32
      %38 = tpu.assume_multiple %37, 8 : i32
      %39 = arith.index_cast %38 : i32 to index
      %c0_30 = arith.constant 0 : index
      %40 = vector.load %arg4[%39, %c0_30] : memref<32x128xf32, #tpu.memory_space<vmem>>, vector<8x128xf32>
      %41 = arith.select %4, %34, %36 : vector<8x128xi1>, vector<8x128xf32>
      %c1_i32_31 = arith.constant 1 : i32
      %42 = tpu.dynamic_rotate %41 by %c1_i32_31 dim 0 : vector<8x128xf32>, i32 -> vector<8x128xf32>
      %43 = arith.select %2, %40, %36 : vector<8x128xi1>, vector<8x128xf32>
      %c7_i32_32 = arith.constant 7 : i32
      %44 = tpu.dynamic_rotate %43 by %c7_i32_32 dim 0 : vector<8x128xf32>, i32 -> vector<8x128xf32>
      %45 = arith.addf %42, %36 : vector<8x128xf32>
      %46 = arith.addf %45, %44 : vector<8x128xf32>
      %47 = arith.subf %42, %44 : vector<8x128xf32>
      %c1_i32_33 = arith.constant 1 : i32
      %48 = tpu.dynamic_rotate %46 by %c1_i32_33 dim 1 : vector<8x128xf32>, i32 -> vector<8x128xf32>
      %c127_i32 = arith.constant 127 : i32
      %49 = tpu.dynamic_rotate %46 by %c127_i32 dim 1 : vector<8x128xf32>, i32 -> vector<8x128xf32>
      %50 = arith.subf %48, %49 : vector<8x128xf32>
      %cst_34 = arith.constant 0.333333343 : f32
      %51 = vector.broadcast %cst_34 : f32 to vector<8x128xf32>
      %52 = arith.mulf %50, %51 : vector<8x128xf32>
      %c1_i32_35 = arith.constant 1 : i32
      %53 = tpu.dynamic_rotate %47 by %c1_i32_35 dim 1 : vector<8x128xf32>, i32 -> vector<8x128xf32>
      %54 = arith.addf %53, %47 : vector<8x128xf32>
      %c127_i32_36 = arith.constant 127 : i32
      %55 = tpu.dynamic_rotate %47 by %c127_i32_36 dim 1 : vector<8x128xf32>, i32 -> vector<8x128xf32>
      %56 = arith.addf %54, %55 : vector<8x128xf32>
      %cst_37 = arith.constant 0.333333343 : f32
      %57 = vector.broadcast %cst_37 : f32 to vector<8x128xf32>
      %58 = arith.mulf %56, %57 : vector<8x128xf32>
      %c8_i32_38 = arith.constant 8 : i32
      %59 = arith.subi %30, %c8_i32_38 : i32
      %60 = tpu.assume_multiple %59, 8 : i32
      %61 = arith.index_cast %60 : i32 to index
      %c0_39 = arith.constant 0 : index
      %62 = vector.load %arg5[%61, %c0_39] : memref<32x128xf32, #tpu.memory_space<vmem>>, vector<8x128xf32>
      %63 = arith.index_cast %30 : i32 to index
      %c0_40 = arith.constant 0 : index
      %64 = vector.load %arg5[%63, %c0_40] : memref<32x128xf32, #tpu.memory_space<vmem>>, vector<8x128xf32>
      %c8_i32_41 = arith.constant 8 : i32
      %65 = arith.addi %30, %c8_i32_41 : i32
      %66 = tpu.assume_multiple %65, 8 : i32
      %67 = arith.index_cast %66 : i32 to index
      %c0_42 = arith.constant 0 : index
      %68 = vector.load %arg5[%67, %c0_42] : memref<32x128xf32, #tpu.memory_space<vmem>>, vector<8x128xf32>
      %69 = arith.select %4, %62, %64 : vector<8x128xi1>, vector<8x128xf32>
      %c1_i32_43 = arith.constant 1 : i32
      %70 = tpu.dynamic_rotate %69 by %c1_i32_43 dim 0 : vector<8x128xf32>, i32 -> vector<8x128xf32>
      %71 = arith.select %2, %68, %64 : vector<8x128xi1>, vector<8x128xf32>
      %c7_i32_44 = arith.constant 7 : i32
      %72 = tpu.dynamic_rotate %71 by %c7_i32_44 dim 0 : vector<8x128xf32>, i32 -> vector<8x128xf32>
      %73 = arith.addf %70, %64 : vector<8x128xf32>
      %74 = arith.addf %73, %72 : vector<8x128xf32>
      %75 = arith.subf %70, %72 : vector<8x128xf32>
      %c1_i32_45 = arith.constant 1 : i32
      %76 = tpu.dynamic_rotate %74 by %c1_i32_45 dim 1 : vector<8x128xf32>, i32 -> vector<8x128xf32>
      %c127_i32_46 = arith.constant 127 : i32
      %77 = tpu.dynamic_rotate %74 by %c127_i32_46 dim 1 : vector<8x128xf32>, i32 -> vector<8x128xf32>
      %78 = arith.subf %76, %77 : vector<8x128xf32>
      %cst_47 = arith.constant 0.333333343 : f32
      %79 = vector.broadcast %cst_47 : f32 to vector<8x128xf32>
      %80 = arith.mulf %78, %79 : vector<8x128xf32>
      %c1_i32_48 = arith.constant 1 : i32
      %81 = tpu.dynamic_rotate %75 by %c1_i32_48 dim 1 : vector<8x128xf32>, i32 -> vector<8x128xf32>
      %82 = arith.addf %81, %75 : vector<8x128xf32>
      %c127_i32_49 = arith.constant 127 : i32
      %83 = tpu.dynamic_rotate %75 by %c127_i32_49 dim 1 : vector<8x128xf32>, i32 -> vector<8x128xf32>
      %84 = arith.addf %82, %83 : vector<8x128xf32>
      %cst_50 = arith.constant 0.333333343 : f32
      %85 = vector.broadcast %cst_50 : f32 to vector<8x128xf32>
      %86 = arith.mulf %84, %85 : vector<8x128xf32>
      %87 = arith.mulf %52, %52 : vector<8x128xf32>
      %88 = arith.mulf %58, %58 : vector<8x128xf32>
      %89 = arith.addf %87, %88 : vector<8x128xf32>
      %90 = arith.mulf %80, %80 : vector<8x128xf32>
      %91 = arith.mulf %86, %86 : vector<8x128xf32>
      %92 = arith.addf %90, %91 : vector<8x128xf32>
      %93 = arith.addf %52, %80 : vector<8x128xf32>
      %94 = arith.addf %58, %86 : vector<8x128xf32>
      %95 = arith.mulf %93, %93 : vector<8x128xf32>
      %96 = arith.mulf %94, %94 : vector<8x128xf32>
      %97 = arith.addf %95, %96 : vector<8x128xf32>
      %cst_51 = arith.constant 2.500000e-01 : f32
      %98 = vector.broadcast %cst_51 : f32 to vector<8x128xf32>
      %99 = arith.mulf %98, %97 : vector<8x128xf32>
      %100 = math.sqrt %89 : vector<8x128xf32>
      %101 = math.sqrt %92 : vector<8x128xf32>
      %102 = math.sqrt %99 : vector<8x128xf32>
      %cst_52 = arith.constant 2.000000e+00 : f32
      %103 = vector.broadcast %cst_52 : f32 to vector<8x128xf32>
      %104 = arith.mulf %103, %100 : vector<8x128xf32>
      %105 = arith.mulf %104, %101 : vector<8x128xf32>
      %cst_53 = arith.constant 0.00215301802 : f32
      %106 = vector.broadcast %cst_53 : f32 to vector<8x128xf32>
      %107 = arith.addf %105, %106 : vector<8x128xf32>
      %108 = arith.addf %89, %92 : vector<8x128xf32>
      %cst_54 = arith.constant 0.00215301802 : f32
      %109 = vector.broadcast %cst_54 : f32 to vector<8x128xf32>
      %110 = arith.addf %108, %109 : vector<8x128xf32>
      %111 = tpu.reciprocal %110 {approx = true} : vector<8x128xf32> -> vector<8x128xf32>
      %112 = arith.mulf %110, %111 : vector<8x128xf32>
      %cst_55 = arith.constant 2.000000e+00 : f32
      %113 = vector.broadcast %cst_55 : f32 to vector<8x128xf32>
      %114 = arith.subf %113, %112 : vector<8x128xf32>
      %115 = arith.mulf %111, %114 : vector<8x128xf32>
      %116 = arith.mulf %107, %115 : vector<8x128xf32>
      %cst_56 = arith.constant 2.000000e+00 : f32
      %117 = vector.broadcast %cst_56 : f32 to vector<8x128xf32>
      %118 = arith.mulf %117, %100 : vector<8x128xf32>
      %119 = arith.mulf %118, %102 : vector<8x128xf32>
      %cst_57 = arith.constant 8.45828501E-4 : f32
      %120 = vector.broadcast %cst_57 : f32 to vector<8x128xf32>
      %121 = arith.addf %119, %120 : vector<8x128xf32>
      %122 = arith.addf %89, %99 : vector<8x128xf32>
      %cst_58 = arith.constant 8.45828501E-4 : f32
      %123 = vector.broadcast %cst_58 : f32 to vector<8x128xf32>
      %124 = arith.addf %122, %123 : vector<8x128xf32>
      %125 = tpu.reciprocal %124 {approx = true} : vector<8x128xf32> -> vector<8x128xf32>
      %126 = arith.mulf %124, %125 : vector<8x128xf32>
      %cst_59 = arith.constant 2.000000e+00 : f32
      %127 = vector.broadcast %cst_59 : f32 to vector<8x128xf32>
      %128 = arith.subf %127, %126 : vector<8x128xf32>
      %129 = arith.mulf %125, %128 : vector<8x128xf32>
      %130 = arith.mulf %121, %129 : vector<8x128xf32>
      %131 = arith.addf %116, %130 : vector<8x128xf32>
      %cst_60 = arith.constant 2.000000e+00 : f32
      %132 = vector.broadcast %cst_60 : f32 to vector<8x128xf32>
      %133 = arith.mulf %132, %101 : vector<8x128xf32>
      %134 = arith.mulf %133, %102 : vector<8x128xf32>
      %cst_61 = arith.constant 8.45828501E-4 : f32
      %135 = vector.broadcast %cst_61 : f32 to vector<8x128xf32>
      %136 = arith.addf %134, %135 : vector<8x128xf32>
      %137 = arith.addf %92, %99 : vector<8x128xf32>
      %cst_62 = arith.constant 8.45828501E-4 : f32
      %138 = vector.broadcast %cst_62 : f32 to vector<8x128xf32>
      %139 = arith.addf %137, %138 : vector<8x128xf32>
      %140 = tpu.reciprocal %139 {approx = true} : vector<8x128xf32> -> vector<8x128xf32>
      %141 = arith.mulf %139, %140 : vector<8x128xf32>
      %cst_63 = arith.constant 2.000000e+00 : f32
      %142 = vector.broadcast %cst_63 : f32 to vector<8x128xf32>
      %143 = arith.subf %142, %141 : vector<8x128xf32>
      %144 = arith.mulf %140, %143 : vector<8x128xf32>
      %145 = arith.mulf %136, %144 : vector<8x128xf32>
      %146 = arith.subf %131, %145 : vector<8x128xf32>
      %c0_64 = arith.constant 0 : index
      %c0_65 = arith.constant 0 : index
      %147 = arith.index_cast %28 : i32 to index
      %c0_66 = arith.constant 0 : index
      %148 = vector.load %arg1[%c0_64, %c0_65, %147, %c0_66] : memref<1x3x16x128xf32, #tpu.memory_space<vmem>>, vector<1x1x8x128xf32>
      %149 = vector.shape_cast %148 : vector<1x1x8x128xf32> to vector<8x128xf32>
      %c0_67 = arith.constant 0 : index
      %c1 = arith.constant 1 : index
      %150 = arith.index_cast %28 : i32 to index
      %c0_68 = arith.constant 0 : index
      %151 = vector.load %arg1[%c0_67, %c1, %150, %c0_68] : memref<1x3x16x128xf32, #tpu.memory_space<vmem>>, vector<1x1x8x128xf32>
      %152 = vector.shape_cast %151 : vector<1x1x8x128xf32> to vector<8x128xf32>
      %c0_69 = arith.constant 0 : index
      %c2 = arith.constant 2 : index
      %153 = arith.index_cast %28 : i32 to index
      %c0_70 = arith.constant 0 : index
      %154 = vector.load %arg1[%c0_69, %c2, %153, %c0_70] : memref<1x3x16x128xf32, #tpu.memory_space<vmem>>, vector<1x1x8x128xf32>
      %155 = vector.shape_cast %154 : vector<1x1x8x128xf32> to vector<8x128xf32>
      %c0_71 = arith.constant 0 : index
      %c0_72 = arith.constant 0 : index
      %156 = arith.index_cast %28 : i32 to index
      %c0_73 = arith.constant 0 : index
      %157 = vector.load %arg2[%c0_71, %c0_72, %156, %c0_73] : memref<1x3x16x128xf32, #tpu.memory_space<vmem>>, vector<1x1x8x128xf32>
      %158 = vector.shape_cast %157 : vector<1x1x8x128xf32> to vector<8x128xf32>
      %c0_74 = arith.constant 0 : index
      %c1_75 = arith.constant 1 : index
      %159 = arith.index_cast %28 : i32 to index
      %c0_76 = arith.constant 0 : index
      %160 = vector.load %arg2[%c0_74, %c1_75, %159, %c0_76] : memref<1x3x16x128xf32, #tpu.memory_space<vmem>>, vector<1x1x8x128xf32>
      %161 = vector.shape_cast %160 : vector<1x1x8x128xf32> to vector<8x128xf32>
      %c0_77 = arith.constant 0 : index
      %c2_78 = arith.constant 2 : index
      %162 = arith.index_cast %28 : i32 to index
      %c0_79 = arith.constant 0 : index
      %163 = vector.load %arg2[%c0_77, %c2_78, %162, %c0_79] : memref<1x3x16x128xf32, #tpu.memory_space<vmem>>, vector<1x1x8x128xf32>
      %164 = vector.shape_cast %163 : vector<1x1x8x128xf32> to vector<8x128xf32>
      %cst_80 = arith.constant 3.000000e-01 : f32
      %165 = vector.broadcast %cst_80 : f32 to vector<8x128xf32>
      %166 = arith.mulf %165, %149 : vector<8x128xf32>
      %cst_81 = arith.constant 4.000000e-02 : f32
      %167 = vector.broadcast %cst_81 : f32 to vector<8x128xf32>
      %168 = arith.mulf %167, %152 : vector<8x128xf32>
      %169 = arith.addf %166, %168 : vector<8x128xf32>
      %cst_82 = arith.constant 3.500000e-01 : f32
      %170 = vector.broadcast %cst_82 : f32 to vector<8x128xf32>
      %171 = arith.mulf %170, %155 : vector<8x128xf32>
      %172 = arith.subf %169, %171 : vector<8x128xf32>
      %cst_83 = arith.constant 3.400000e-01 : f32
      %173 = vector.broadcast %cst_83 : f32 to vector<8x128xf32>
      %174 = arith.mulf %173, %149 : vector<8x128xf32>
      %cst_84 = arith.constant 6.000000e-01 : f32
      %175 = vector.broadcast %cst_84 : f32 to vector<8x128xf32>
      %176 = arith.mulf %175, %152 : vector<8x128xf32>
      %177 = arith.subf %174, %176 : vector<8x128xf32>
      %cst_85 = arith.constant 1.700000e-01 : f32
      %178 = vector.broadcast %cst_85 : f32 to vector<8x128xf32>
      %179 = arith.mulf %178, %155 : vector<8x128xf32>
      %180 = arith.addf %177, %179 : vector<8x128xf32>
      %cst_86 = arith.constant 3.000000e-01 : f32
      %181 = vector.broadcast %cst_86 : f32 to vector<8x128xf32>
      %182 = arith.mulf %181, %158 : vector<8x128xf32>
      %cst_87 = arith.constant 4.000000e-02 : f32
      %183 = vector.broadcast %cst_87 : f32 to vector<8x128xf32>
      %184 = arith.mulf %183, %161 : vector<8x128xf32>
      %185 = arith.addf %182, %184 : vector<8x128xf32>
      %cst_88 = arith.constant 3.500000e-01 : f32
      %186 = vector.broadcast %cst_88 : f32 to vector<8x128xf32>
      %187 = arith.mulf %186, %164 : vector<8x128xf32>
      %188 = arith.subf %185, %187 : vector<8x128xf32>
      %cst_89 = arith.constant 3.400000e-01 : f32
      %189 = vector.broadcast %cst_89 : f32 to vector<8x128xf32>
      %190 = arith.mulf %189, %158 : vector<8x128xf32>
      %cst_90 = arith.constant 6.000000e-01 : f32
      %191 = vector.broadcast %cst_90 : f32 to vector<8x128xf32>
      %192 = arith.mulf %191, %161 : vector<8x128xf32>
      %193 = arith.subf %190, %192 : vector<8x128xf32>
      %cst_91 = arith.constant 1.700000e-01 : f32
      %194 = vector.broadcast %cst_91 : f32 to vector<8x128xf32>
      %195 = arith.mulf %194, %164 : vector<8x128xf32>
      %196 = arith.addf %193, %195 : vector<8x128xf32>
      %197 = arith.mulf %172, %188 : vector<8x128xf32>
      %198 = arith.mulf %180, %196 : vector<8x128xf32>
      %199 = arith.addf %197, %198 : vector<8x128xf32>
      %cst_92 = arith.constant 2.000000e+00 : f32
      %200 = vector.broadcast %cst_92 : f32 to vector<8x128xf32>
      %201 = arith.mulf %200, %199 : vector<8x128xf32>
      %cst_93 = arith.constant 0.00845828559 : f32
      %202 = vector.broadcast %cst_93 : f32 to vector<8x128xf32>
      %203 = arith.addf %201, %202 : vector<8x128xf32>
      %204 = arith.mulf %172, %172 : vector<8x128xf32>
      %205 = arith.mulf %180, %180 : vector<8x128xf32>
      %206 = arith.addf %204, %205 : vector<8x128xf32>
      %207 = arith.mulf %188, %188 : vector<8x128xf32>
      %208 = arith.addf %206, %207 : vector<8x128xf32>
      %209 = arith.mulf %196, %196 : vector<8x128xf32>
      %210 = arith.addf %208, %209 : vector<8x128xf32>
      %cst_94 = arith.constant 0.00845828559 : f32
      %211 = vector.broadcast %cst_94 : f32 to vector<8x128xf32>
      %212 = arith.addf %210, %211 : vector<8x128xf32>
      %213 = tpu.reciprocal %212 {approx = true} : vector<8x128xf32> -> vector<8x128xf32>
      %214 = arith.mulf %212, %213 : vector<8x128xf32>
      %cst_95 = arith.constant 2.000000e+00 : f32
      %215 = vector.broadcast %cst_95 : f32 to vector<8x128xf32>
      %216 = arith.subf %215, %214 : vector<8x128xf32>
      %217 = arith.mulf %213, %216 : vector<8x128xf32>
      %218 = arith.mulf %203, %217 : vector<8x128xf32>
      %cst_96 = arith.constant 6.000000e-01 : f32
      %219 = vector.broadcast %cst_96 : f32 to vector<8x128xf32>
      %220 = arith.mulf %219, %146 : vector<8x128xf32>
      %cst_97 = arith.constant 4.000000e-01 : f32
      %221 = vector.broadcast %cst_97 : f32 to vector<8x128xf32>
      %222 = arith.mulf %221, %218 : vector<8x128xf32>
      %223 = arith.addf %220, %222 : vector<8x128xf32>
      %224 = math.absf %223 : vector<8x128xf32>
      %225 = math.sqrt %224 : vector<8x128xf32>
      %226 = math.sqrt %225 : vector<8x128xf32>
      %227 = arith.mulf %226, %9 : vector<8x128xf32>
      %cst_98 = arith.constant 0.000000e+00 : f32
      %228 = vector.broadcast %cst_98 : f32 to vector<8x128xf32>
      %229 = arith.cmpf olt, %223, %228 : vector<8x128xf32>
      %cst_99 = arith.constant 0.707106769 : f32
      %cst_100 = arith.constant 1.000000e+00 : f32
      %230 = vector.broadcast %cst_99 : f32 to vector<8x128xf32>
      %231 = vector.broadcast %cst_100 : f32 to vector<8x128xf32>
      %232 = arith.select %229, %230, %231 : vector<8x128xi1>, vector<8x128xf32>
      %233 = arith.mulf %227, %232 : vector<8x128xf32>
      %cst_101 = arith.constant 0.707106769 : f32
      %cst_102 = arith.constant 0.000000e+00 : f32
      %234 = vector.broadcast %cst_101 : f32 to vector<8x128xf32>
      %235 = vector.broadcast %cst_102 : f32 to vector<8x128xf32>
      %236 = arith.select %229, %234, %235 : vector<8x128xi1>, vector<8x128xf32>
      %237 = arith.mulf %227, %236 : vector<8x128xf32>
      %238 = arith.index_cast %28 : i32 to index
      %c0_103 = arith.constant 0 : index
      %239 = vector.load %arg6[%238, %c0_103] : memref<16x128xf32, #tpu.memory_space<vmem>>, vector<8x128xf32>
      tpu.vector_store %arg6[%238, %c0_103], %233 {strides = array<i32>} : memref<16x128xf32, #tpu.memory_space<vmem>>, vector<8x128xf32>,
      %240 = arith.index_cast %28 : i32 to index
      %c0_104 = arith.constant 0 : index
      %241 = vector.load %arg7[%240, %c0_104] : memref<16x128xf32, #tpu.memory_space<vmem>>, vector<8x128xf32>
      tpu.vector_store %arg7[%240, %c0_104], %237 {strides = array<i32>} : memref<16x128xf32, #tpu.memory_space<vmem>>, vector<8x128xf32>,
      %242 = vector.shape_cast %233 : vector<8x128xf32> to vector<1x8x128xf32>
      %cst_105 = arith.constant dense<0.000000e+00> : vector<1xf32>
      %243 = vector.multi_reduction <add>, %242, %cst_105 [1, 2] : vector<1x8x128xf32> to vector<1xf32>
      %244 = vector.shape_cast %243 : vector<1xf32> to vector<1x1x1xf32>
      %245 = vector.extract %244[0, 0, 0] : f32 from vector<1x1x1xf32>
      %246 = arith.addf %arg9, %245 : f32
      %247 = vector.shape_cast %237 : vector<8x128xf32> to vector<1x8x128xf32>
      %cst_106 = arith.constant dense<0.000000e+00> : vector<1xf32>
      %248 = vector.multi_reduction <add>, %247, %cst_106 [1, 2] : vector<1x8x128xf32> to vector<1xf32>
      %249 = vector.shape_cast %248 : vector<1xf32> to vector<1x1x1xf32>
      %250 = vector.extract %249[0, 0, 0] : f32 from vector<1x1x1xf32>
      %251 = arith.addf %arg10, %250 : f32
      scf.yield %246, %251 : f32, f32
    }
    %c2_i32_13 = arith.constant 2 : i32
    %cst_14 = arith.constant 3.906250e-03 : f32
    %18 = arith.mulf %17#0, %cst_14 : f32
    %cst_15 = arith.constant 3.906250e-03 : f32
    %19 = arith.mulf %17#1, %cst_15 : f32
    %cst_16 = arith.constant 0.000000e+00 : f32
    %c0_i32_17 = arith.constant 0 : i32
    %c2_i32_18 = arith.constant 2 : i32
    %20 = arith.addi %c0_i32_17, %c2_i32_18 : i32
    %c1_i32_19 = arith.constant 1 : i32
    %21 = scf.for %arg8 = %c0_i32_17 to %20 step %c1_i32_19 iter_args(%arg9 = %cst_16) -> (f32)  : i32 {
      %c8_i32 = arith.constant 8 : i32
      %27 = arith.muli %arg8, %c8_i32 : i32
      %28 = tpu.assume_multiple %27, 8 : i32
      %29 = arith.index_cast %28 : i32 to index
      %c0_25 = arith.constant 0 : index
      %30 = vector.load %arg6[%29, %c0_25] : memref<16x128xf32, #tpu.memory_space<vmem>>, vector<8x128xf32>
      %31 = arith.index_cast %28 : i32 to index
      %c0_26 = arith.constant 0 : index
      %32 = vector.load %arg7[%31, %c0_26] : memref<16x128xf32, #tpu.memory_space<vmem>>, vector<8x128xf32>
      %33 = vector.broadcast %18 : f32 to vector<8x128xf32>
      %34 = arith.subf %30, %33 : vector<8x128xf32>
      %35 = vector.broadcast %19 : f32 to vector<8x128xf32>
      %36 = arith.subf %32, %35 : vector<8x128xf32>
      %37 = arith.mulf %34, %34 : vector<8x128xf32>
      %38 = arith.mulf %36, %36 : vector<8x128xf32>
      %39 = arith.addf %37, %38 : vector<8x128xf32>
      %40 = math.sqrt %39 : vector<8x128xf32>
      %41 = arith.mulf %40, %9 : vector<8x128xf32>
      %42 = vector.shape_cast %41 : vector<8x128xf32> to vector<1x8x128xf32>
      %cst_27 = arith.constant dense<0.000000e+00> : vector<1xf32>
      %43 = vector.multi_reduction <add>, %42, %cst_27 [1, 2] : vector<1x8x128xf32> to vector<1xf32>
      %44 = vector.shape_cast %43 : vector<1xf32> to vector<1x1x1xf32>
      %45 = vector.extract %44[0, 0, 0] : f32 from vector<1x1x1xf32>
      %46 = arith.addf %arg9, %45 : f32
      scf.yield %46 : f32
    }
    %c2_i32_20 = arith.constant 2 : i32
    %cst_21 = arith.constant 3.906250e-03 : f32
    %22 = arith.mulf %21, %cst_21 : f32
    %23 = math.sqrt %22 : f32
    %24 = math.sqrt %23 : f32
    %25 = vector.broadcast %24 : f32 to vector<1x1x128xf32>
    %c0_22 = arith.constant 0 : index
    %c0_23 = arith.constant 0 : index
    %c0_24 = arith.constant 0 : index
    %26 = vector.load %arg3[%c0_22, %c0_23, %c0_24] : memref<1x1x128xf32, #tpu.memory_space<vmem>>, vector<1x1x128xf32>
    tpu.vector_store %arg3[%c0_22, %c0_23, %c0_24], %25 {strides = array<i32>} : memref<1x1x128xf32, #tpu.memory_space<vmem>>, vector<1x1x128xf32>,
    return
  }
  func.func @transform_0(%arg0: i32) -> (i32, i32, i32, i32) {
    %c0_i32 = arith.constant 0 : i32
    %c0_i32_0 = arith.constant 0 : i32
    %c0_i32_1 = arith.constant 0 : i32
    %c0_i32_2 = arith.constant 0 : i32
    return %arg0, %c0_i32, %c0_i32_0, %c0_i32_1 : i32, i32, i32, i32
  }
  func.func @transform_1(%arg0: i32) -> (i32, i32, i32, i32) {
    %c0_i32 = arith.constant 0 : i32
    %c0_i32_0 = arith.constant 0 : i32
    %c0_i32_1 = arith.constant 0 : i32
    %c0_i32_2 = arith.constant 0 : i32
    return %arg0, %c0_i32, %c0_i32_0, %c0_i32_1 : i32, i32, i32, i32
  }
  func.func @transform_2(%arg0: i32) -> (i32, i32, i32) {
    %c0_i32 = arith.constant 0 : i32
    %c0_i32_0 = arith.constant 0 : i32
    %c0_i32_1 = arith.constant 0 : i32
    return %arg0, %c0_i32, %c0_i32_0 : i32, i32, i32
  }
}

</mosaic_0001>

<bundles_post_ra>
// kernel: mdsi_pallas.1
= control target key start
LH: loop header
LB: loop body
LE: loop exit
PB: predicated region body
PF: predicated region fallthrough
CT: control target
= control target key end

     0   :  { %s858_s9 = smov 0   ;;  %s978_s0 = inlined_call_operand.vmem [shape: f32[2,3,16,128], index: 0, kind: input, shape index: {}]   ;;  %s979_s1 = inlined_call_operand.vmem [shape: f32[2,3,16,128], index: 1, kind: input, shape index: {}]   ;;  %s980_s2 = inlined_call_operand.vmem [shape: f32[2,1,128], index: 2, kind: output, shape index: {}]  }
   0x1 LB: > { %s640_s10 = sadd.s32 4294967295, %s812_s9   ;;  %p644_p0 = scmp.ge.s32.totalorder %s812_s9, 1  ;;  %s812_s9 = sphi %s858_s9, %s12_s9  }
   0x2   : > { %p122_p1 = scmp.lt.s32.totalorder %s812_s9, 3 }
   0x4   : > { %p123_p2 = pnand %p644_p0, %p122_p1 }
   0x5   : > { %p147_p3 = scmp.lt.s32.totalorder (!%p123_p2), %s640_s10, 1  ;;  %s889_s21 = smov (!%p123_p2), 0  }
   0x6   : > { %126 = sbr.rel (%p123_p2) target bundleno = 836 (0x344), region = 28 }
   0xb   : > { %v160_v0 = vlaneseq  ;;  %v838_v1 = vmov 0.0   ;;  %s987_s10 = smov (!%p147_p3, %s640_s10), 1 }
   0xc   : > { %169 = vst [vmem:[#allocation2] sm:$0xff] %v838_v1  ;;  %170 = vst [vmem:[#allocation3] sm:$0xff] %v838_v1  ;;  %s686_s11 = smul.u32 48, %s987_s10  ;;  %s159_s14 = scalar_lea.vmem %s980_s2, %s987_s10 }
   0xd   : > { %171 = vst [vmem:[#allocation2 + $0x18] sm:$0xff] %v838_v1  ;;  %172 = vst [vmem:[#allocation3 + $0x18] sm:$0xff] %v838_v1  ;;  %v868_v2 = vshrl.u32 %v160_v0, 7  ;;  %v165_v3 = vand.u32 127, %v160_v0 }
   0xe   : > { %s882_s17 = scalar_lea.vmem %s978_s0, %s686_s11  ;;  %s887_s20 = scalar_lea.vmem %s979_s1, %s686_s11 }
   0xf   : > { %vm162_vm0 = vcmp.eq.s32.totalorder %v868_v2, 0  ;;  %vm163_vm1 = vcmp.eq.s32.totalorder %v868_v2, 7  ;;  %vm166_vm2 = vcmp.lt.s32.totalorder %v165_v3, 16 }
  0x10   : > { %v877_v4 = vsel %vm166_vm2, 1.0, %v838_v1 }
  0x11 LB: >> { %s648_s22 = sshll.u32 %s816_s21, 3  ;;  %s178_s21 = sadd.s32 1, %s816_s21   ;;  %s816_s21 = sphi %s889_s21, %s178_s21  }
  0x12   : >> { %s181_s23 = scalar_lea.vmem %s882_s17, %s648_s22  ;;  %s189_s24 = scalar_lea.vmem %s887_s20, %s648_s22 }
  0x13   : >> { %v182_v5 = vld [vmem:[%s181_s23] sm:$0xff]  ;;  %v650_v6 = vld [vmem:[%s181_s23 + $0x10] sm:$0xff]  ;;  %s545_s25 = scalar_lea.vmem [#allocation2], %s648_s22  ;;  %s548_s26 = scalar_lea.vmem [#allocation3], %s648_s22 }
  0x14   : >> { %v652_v7 = vld [vmem:[%s181_s23 + $0x20] sm:$0xff]  ;;  %v195_v8 = vmul.f32 0.2989, %v182_v5  ;;  %v196_v9 = vmul.f32 0.587, %v650_v6  ;;  %v654_v12 = vld [vmem:[%s189_s24 + $0x10] sm:$0xff] }
  0x15   : >> { %v198_v10 = vmul.f32 0.114, %v652_v7  ;;  %v190_v11 = vld [vmem:[%s189_s24] sm:$0xff]  ;;  %v203_v16 = vmul.f32 0.587, %v654_v12  ;;  %p175_p4 = scmp.ge.s32.totalorder %s178_s21, 2  }
  0x16   : >> { %v656_v13 = vld [vmem:[%s189_s24 + $0x20] sm:$0xff]  ;;  %v197_v14 = vadd.f32 %v196_v9, %v195_v8  ;;  %v202_v15 = vmul.f32 0.2989, %v190_v11  ;;  %s896_s27 = smov (%p175_p4), 0.0   ;;  %s898_s28 = smov (%p175_p4), 0.0  }
  0x17   : >> { %v205_v17 = vmul.f32 0.114, %v656_v13  ;;  %s900_s29 = smov (%p175_p4), 0  }
  0x18   : >> { %v199_v18 = vadd.f32 %v198_v10, %v197_v14  ;;  %v204_v19 = vadd.f32 %v203_v16, %v202_v15  ;;  %177 = sbr.rel (!%p175_p4) target bundleno = 17 (0x11), region = 106 }
  0x1a   : >> { %658 = vst [vmem:[%s545_s25 + $0x8] sm:$0xff] %v199_v18  ;;  %v206_v20 = vadd.f32 %v205_v17, %v204_v19 }
  0x1c   : >> { %660 = vst [vmem:[%s548_s26 + $0x8] sm:$0xff] %v206_v20 }
  0x1d LB: >> { %s912_s30 = sshll.u32 %s828_s29, 3  ;;  %s839_s5 = smov 1   ;;  %s828_s29 = sphi %s900_s29, %s214_s29   ;;  %s824_s28 = sphi %s898_s28, %s984_s28   ;;  %s820_s27 = sphi %s896_s27, %s983_s27  }
  0x1e   : >> { %s684_s3 = scalar_lea.vmem [#allocation2], %s912_s30  ;;  %s685_s4 = scalar_lea.vmem [#allocation3], %s912_s30 }
  0x1f   : >> { %s840_s6 = smov 127   ;;  %s337_s7 = scalar_lea.vmem %s882_s17, %s912_s30 }
  0x20   : >> { %v338_v41 = vld [vmem:[%s337_s7] sm:$0xff]  ;;  %v674_v42 = vld [vmem:[%s337_s7 + $0x10] sm:$0xff]  ;;  %s345_s8 = scalar_lea.vmem %s887_s20, %s912_s30  ;;  %s415_s11 = scalar_lea.vmem [#allocation5], %s912_s30 }
  0x21   : >> { %v221_v21 = vld [vmem:[%s684_s3] sm:$0xff]  ;;  %v665_v22 = vld [vmem:[%s684_s3 + $0x8] sm:$0xff]  ;;  %v667_v23 = vld [vmem:[%s684_s3 + $0x10] sm:$0xff]  ;;  %v351_v43 = vmul.f32 0.3, %v338_v41  ;;  %s413_s12 = scalar_lea.vmem [#allocation4], %s912_s30 }
  0x22   : >> { %v227_v24 = vsel %vm163_vm1, %v221_v21, %v665_v22  ;;  %v229_v25 = vsel %vm162_vm0, %v667_v23, %v665_v22  ;;  %v352_v44 = vmul.f32 0.04, %v674_v42  ;;  %v676_v45 = vld [vmem:[%s337_s7 + $0x20] sm:$0xff]  ;;  %v356_v46 = vmul.f32 0.34, %v338_v41  ;;  %v678_v49 = vld [vmem:[%s345_s8 + $0x10] sm:$0xff] }
  0x23   : >> { %v248_v26 = vld [vmem:[%s685_s4] sm:$0xff]  ;;  %v670_v27 = vld [vmem:[%s685_s4 + $0x8] sm:$0xff]  ;;  %v672_v28 = vld [vmem:[%s685_s4 + $0x10] sm:$0xff]  ;;  %v228_v29 = vrot.slane %v227_v24, 7  ;;  %v230_v30 = vrot.slane %v229_v25, 1  ;;  %s214_s29 = sadd.s32 1, %s828_s29  }
  0x24   : >> { %v253_v31 = vsel %vm163_vm1, %v248_v26, %v670_v27  ;;  %v255_v32 = vsel %vm162_vm0, %v672_v28, %v670_v27  ;;  %v357_v47 = vmul.f32 0.6, %v674_v42  ;;  %v346_v48 = vld [vmem:[%s345_s8] sm:$0xff]  ;;  %v353_v50 = vadd.f32 %v352_v44, %v351_v43  ;;  %p211_p5 = scmp.ge.s32.totalorder %s214_s29, 2  }
  0x25   : >> { %v254_v33 = vrot.slane %v253_v31, 7  ;;  %v256_v34 = vrot.slane %v255_v32, 1  ;;  %v233_v35 = vsub.f32 %v228_v29, %v230_v30  ;;  %v231_v36 = vadd.f32 %v665_v22, %v228_v29  ;;  %v680_v56 = vld [vmem:[%s345_s8 + $0x20] sm:$0xff]  ;;  %s948_s22 = smov (%p211_p5), 0.0   ;;  %s950_s23 = smov (%p211_p5), 0  }
  0x26   : >> { %v354_v51 = vmul.f32 0.35, %v676_v45  ;;  %v358_v52 = vsub.f32 %v356_v46, %v357_v47  ;;  %v359_v53 = vmul.f32 0.17, %v676_v45  ;;  %v361_v54 = vmul.f32 0.3, %v346_v48 }
  0x27   : >> { %240 = vrot.lane.b32.xlu0 %v233_v35, %s839_s5  ;;  %v232_v37 = vadd.f32 %v231_v36, %v230_v30  ;;  %v259_v38 = vsub.f32 %v254_v33, %v256_v34  ;;  %v257_v39 = vadd.f32 %v670_v27, %v254_v33  ;;  %v362_v55 = vmul.f32 0.04, %v678_v49 }
  0x28   : >> { %v366_v57 = vmul.f32 0.34, %v346_v48  ;;  %v367_v58 = vmul.f32 0.6, %v678_v49  ;;  %v355_v60 = vsub.f32 %v353_v50, %v354_v51  ;;  %v360_v61 = vadd.f32 %v359_v53, %v358_v52 }
  0x29   : >> { %234 = vrot.lane.b32.xlu1 %v232_v37, %s839_s5  ;;  %v258_v40 = vadd.f32 %v257_v39, %v256_v34  ;;  %v363_v62 = vadd.f32 %v362_v55, %v361_v54  ;;  %v364_v63 = vmul.f32 0.35, %v680_v56  ;;  %v369_v6 = vmul.f32 0.17, %v680_v56 }
  0x2a   : >> { %v368_v1 = vsub.f32 %v366_v57, %v367_v58  ;;  %v376_v7 = vmul.f32 %v355_v60, %v355_v60  ;;  %v377_v8 = vmul.f32 %v360_v61, %v360_v61 }
  0x2b   : >> { %266 = vrot.lane.b32.xlu0 %v259_v38, %s839_s5  ;;  %v365_v5 = vsub.f32 %v363_v62, %v364_v63 }
  0x2c   : >> { %v370_v13 = vadd.f32 %v369_v6, %v368_v1  ;;  %v378_v14 = vadd.f32 %v377_v8, %v376_v7 }
  0x2d   : >> { %236 = vrot.lane.b32.xlu1 %v232_v37, %s840_s6  ;;  %v379_v15 = vmul.f32 %v365_v5, %v365_v5  ;;  %v371_v51 = vmul.f32 %v365_v5, %v355_v60 }
  0x2e   : >> { %v381_v22 = vmul.f32 %v370_v13, %v370_v13  ;;  %v372_v52 = vmul.f32 %v370_v13, %v360_v61 }
  0x2f   : >> { %243 = vrot.lane.b32.xlu0 %v233_v35, %s840_s6  ;;  %v380_v21 = vadd.f32 %v379_v15, %v378_v14 }
  0x30   : >> { %v373_v58 = vadd.f32 %v372_v52, %v371_v51  ;;  %v841_v52 = vmov 0.0  }
  0x31   : >> { %260 = vrot.lane.b32.xlu1 %v258_v40, %s839_s5  ;;  %v382_v31 = vadd.f32 %v381_v22, %v380_v21 }
  0x32   : >> { %v374_v8 = vmul.f32 2.0, %v373_v58 }
  0x33   : >> { %262 = vrot.lane.b32.xlu0 %v258_v40, %s840_s6  ;;  %v383_v37 = vadd.f32 0.008458286, %v382_v31 }
  0x35   : >> { %269 = vrot.lane.b32.xlu1 %v259_v38, %s840_s6 }
  0x99   : >> { %v241_v59 = vpop.permute.xlu0 %240 }
  0x9a   : >> { %v242_v10 = vadd.f32 %v241_v59, %v233_v35 }
  0x9b   : >> { %v235_v0 = vpop.permute.xlu1 %234 }
  0x9d   : >> { %v267_v3 = vpop.permute.xlu0 %266 }
  0x9e   : >> { %v268_v23 = vadd.f32 %v267_v3, %v259_v38 }
  0x9f   : >> { %v237_v9 = vpop.permute.xlu1 %236 }
  0xa0   : >> { %v238_v11 = vsub.f32 %v235_v0, %v237_v9 }
  0xa1   : >> { %v244_v12 = vpop.permute.xlu0 %243 }
  0xa2   : >> { %v239_v16 = vmul.f32 0.33333334, %v238_v11  ;;  %v245_v17 = vadd.f32 %v244_v12, %v242_v10 }
  0xa3   : >> { %v261_v18 = vpop.permute.xlu1 %260 }
  0xa4   : >> { %v246_v19 = vmul.f32 0.33333334, %v245_v17  ;;  %v273_v24 = vmul.f32 %v239_v16, %v239_v16 }
  0xa5   : >> { %v263_v20 = vpop.permute.xlu0 %262 }
  0xa6   : >> { %v274_v25 = vmul.f32 %v246_v19, %v246_v19  ;;  %v264_v26 = vsub.f32 %v261_v18, %v263_v20  ;;  %v375_v20 = vadd.f32 0.008458286, %v374_v8 }
  0xa7   : >> { %v270_v27 = vpop.permute.xlu1 %269 }
  0xa8   : >> { %v275_v28 = vadd.f32 %v274_v25, %v273_v24  ;;  %v265_v29 = vmul.f32 0.33333334, %v264_v26  ;;  %v271_v30 = vadd.f32 %v270_v27, %v268_v23 }
  0xaa   : >> { %v279_v32 = vadd.f32 %v265_v29, %v239_v16  ;;  %v272_v33 = vmul.f32 0.33333334, %v271_v30  ;;  %758 = vrsqrt.f32 %v275_v28  ;;  %v276_v34 = vmul.f32 %v265_v29, %v265_v29 }
  0xab   : >> { %vm287_vm3 = vcmp.eq.f32.partialorder %v275_v28, inf  ;;  %v290_v57 = vand.u32 2147483648, %v275_v28  ;;  %vm289_vm5 = vcmp.eq.f32.partialorder %v275_v28, 0.0 }
  0xac   : >> { %v277_v35 = vmul.f32 %v272_v33, %v272_v33  ;;  %v280_v36 = vadd.f32 %v272_v33, %v246_v19  ;;  %v281_v39 = vmul.f32 %v279_v32, %v279_v32 }
  0xae   : >> { %v278_v40 = vadd.f32 %v277_v35, %v276_v34  ;;  %v282_v41 = vmul.f32 %v280_v36, %v280_v36 }
  0xb0   : >> { %v283_v42 = vadd.f32 %v282_v41, %v281_v39  ;;  %760 = vrsqrt.f32 %v278_v40  ;;  %v309_v38 = vadd.f32 %v278_v40, %v275_v28  ;;  %vm294_vm4 = vcmp.eq.f32.partialorder %v278_v40, inf }
  0xb1   : >> { %762 = vrcp.f32 %v383_v37  ;;  %v297_v3 = vand.u32 2147483648, %v278_v40  ;;  %vm296_vm6 = vcmp.eq.f32.partialorder %v278_v40, 0.0 }
  0xb2   : >> { %v284_v43 = vmul.f32 0.25, %v283_v42  ;;  %v310_v44 = vadd.f32 0.002153018, %v309_v38 }
  0xb4   : >> { %764 = vrsqrt.f32 %v284_v43  ;;  %v318_v45 = vadd.f32 %v284_v43, %v275_v28  ;;  %v329_v46 = vadd.f32 %v284_v43, %v278_v40  ;;  %vm301_vm7 = vcmp.eq.f32.partialorder %v284_v43, inf }
  0xb5   : >> { %766 = vrcp.f32 %v310_v44  ;;  %v304_v60 = vand.u32 2147483648, %v284_v43  ;;  %vm303_vm8 = vcmp.eq.f32.partialorder %v284_v43, 0.0 }
  0xb6   : >> { %v319_v47 = vadd.f32 0.0008458285, %v318_v45  ;;  %v330_v48 = vadd.f32 0.0008458285, %v329_v46 }
  0xb7   : >> { %v759_v49 = vpop.eup %758 }
  0xb8   : >> { %768 = vrcp.f32 %v319_v47  ;;  %v286_v50 = vmul.f32 %v759_v49, %v275_v28 }
  0xb9   : >> { %770 = vrcp.f32 %v330_v48 }
  0xba   : >> { %v288_v56 = vsel %vm287_vm3, %v275_v28, %v286_v50 }
  0xbb   : >> { %v291_v1 = vsel %vm289_vm5, %v290_v57, %v288_v56 }
  0xbc   : >> { %v306_v10 = vmul.f32 2.0, %v291_v1 }
  0xbd   : >> { %v761_v53 = vpop.eup %760 }
  0xbe   : >> { %v763_v54 = vpop.eup %762  ;;  %v293_v55 = vmul.f32 %v761_v53, %v278_v40 }
  0xbf   : >> { %v385_v63 = vmul.f32 %v763_v54, %v383_v37 }
  0xc0   : >> { %v295_v62 = vsel %vm294_vm4, %v278_v40, %v293_v55 }
  0xc1   : >> { %v765_v59 = vpop.eup %764  ;;  %v298_v5 = vsel %vm296_vm6, %v297_v3, %v295_v62  ;;  %v386_v12 = vsub.f32 2.0, %v385_v63 }
  0xc2   : >> { %v767_v0 = vpop.eup %766  ;;  %v300_v6 = vmul.f32 %v765_v59, %v284_v43  ;;  %v307_v15 = vmul.f32 %v306_v10, %v298_v5  ;;  %v326_v18 = vmul.f32 2.0, %v298_v5 }
  0xc3   : >> { %v312_v61 = vmul.f32 %v767_v0, %v310_v44  ;;  %v387_v24 = vmul.f32 %v763_v54, %v386_v12  ;;  %v842_v54 = vmov 1.0  }
  0xc4   : >> { %v302_v7 = vsel %vm301_vm7, %v284_v43, %v300_v6  ;;  %v308_v26 = vadd.f32 0.002153018, %v307_v15 }
  0xc5   : >> { %v305_v9 = vsel %vm303_vm8, %v304_v60, %v302_v7  ;;  %v313_v11 = vsub.f32 2.0, %v312_v61  ;;  %v769_v13 = vpop.eup %768  ;;  %v388_v33 = vmul.f32 %v387_v24, %v375_v20 }
  0xc6   : >> { %v771_v14 = vpop.eup %770  ;;  %v316_v16 = vmul.f32 %v306_v10, %v305_v9  ;;  %v321_v17 = vmul.f32 %v769_v13, %v319_v47  ;;  %v327_v23 = vmul.f32 %v326_v18, %v305_v9 }
  0xc7   : >> { %v332_v19 = vmul.f32 %v771_v14, %v330_v48  ;;  %v314_v21 = vmul.f32 %v767_v0, %v313_v11  ;;  %v390_v37 = vmul.f32 0.4, %v388_v33 }
  0xc8   : >> { %v322_v22 = vsub.f32 2.0, %v321_v17  ;;  %v317_v27 = vadd.f32 0.0008458285, %v316_v16  ;;  %v328_v32 = vadd.f32 0.0008458285, %v327_v23 }
  0xc9   : >> { %v333_v25 = vsub.f32 2.0, %v332_v19  ;;  %v315_v30 = vmul.f32 %v314_v21, %v308_v26 }
  0xca   : >> { %v323_v28 = vmul.f32 %v769_v13, %v322_v22 }
  0xcb   : >> { %v334_v29 = vmul.f32 %v771_v14, %v333_v25 }
  0xcc   : >> { %v324_v31 = vmul.f32 %v323_v28, %v317_v27 }
  0xcd   : >> { %v335_v35 = vmul.f32 %v334_v29, %v328_v32 }
  0xce   : >> { %v325_v34 = vadd.f32 %v324_v31, %v315_v30 }
  0xd0   : >> { %v336_v36 = vsub.f32 %v325_v34, %v335_v35 }
  0xd2   : >> { %v389_v39 = vmul.f32 0.6, %v336_v36 }
  0xd4   : >> { %v391_v40 = vadd.f32 %v390_v37, %v389_v39 }
  0xd6   : >> { %v392_v41 = vand.u32 2147483647, %v391_v40  ;;  %vm408_vm13 = vcmp.lt.f32.partialorder %v391_v40, 0.0 }
  0xd7   : >> { %v411_v53 = vsel %vm408_vm13, 0.70710677, %v841_v52  ;;  %v409_v55 = vsel %vm408_vm13, 0.70710677, %v842_v54 }
  0xd8   : >> { %772 = vrsqrt.f32 %v392_v41  ;;  %vm395_vm9 = vcmp.eq.f32.partialorder %v392_v41, inf  ;;  %v398_v43 = vand.u32 2147483648, %v392_v41  ;;  %vm397_vm10 = vcmp.eq.f32.partialorder %v392_v41, 0.0 }
  0xe5   : >> { %v773_v42 = vpop.eup %772 }
  0xe6   : >> { %v394_v38 = vmul.f32 %v773_v42, %v392_v41 }
  0xe8   : >> { %v396_v44 = vsel %vm395_vm9, %v392_v41, %v394_v38 }
  0xe9   : >> { %v399_v45 = vsel %vm397_vm10, %v398_v43, %v396_v44 }
  0xea   : >> { %774 = vrsqrt.f32 %v399_v45  ;;  %vm402_vm11 = vcmp.eq.f32.partialorder %v399_v45, inf  ;;  %v405_v48 = vand.u32 2147483648, %v399_v45  ;;  %vm404_vm12 = vcmp.eq.f32.partialorder %v399_v45, 0.0 }
  0xf7   : >> { %v775_v46 = vpop.eup %774 }
  0xf8   : >> { %v401_v47 = vmul.f32 %v775_v46, %v399_v45 }
  0xfa   : >> { %v403_v49 = vsel %vm402_vm11, %v399_v45, %v401_v47 }
  0xfb   : >> { %v406_v50 = vsel %vm404_vm12, %v405_v48, %v403_v49 }
  0xfc   : >> { %v407_v51 = vmul.f32 %v877_v4, %v406_v50 }
  0xfe   : >> { %v412_v56 = vmul.f32 %v411_v53, %v407_v51  ;;  %v410_v57 = vmul.f32 %v409_v55, %v407_v51 }
 0x100   : >> { %427 = vadd.xlane.f32.xlu1 %v412_v56  ;;  %416 = vst [vmem:[%s415_s11] sm:$0xff] %v412_v56  ;;  %417 = vadd.xlane.f32.xlu0 %v410_v57  ;;  %414 = vst [vmem:[%s413_s12] sm:$0xff] %v410_v57 }
 0x189   : >> { %v428_v58 = vpop.xlane.xlu1 %427  ;;  %v418_v59 = vpop.xlane.xlu0 %417 }
 0x18a   : >> { %v429_v62 = vrot.slane %v428_v58, 4  ;;  %v419_v63 = vrot.slane %v418_v59, 4 }
 0x18c   : >> { %v430_v0 = vadd.f32 %v429_v62, %v428_v58  ;;  %v420_v1 = vadd.f32 %v419_v63, %v418_v59 }
 0x18e   : >> { %v431_v3 = vrot.slane %v430_v0, 2  ;;  %v421_v6 = vrot.slane %v420_v1, 2 }
 0x190   : >> { %v432_v60 = vadd.f32 %v431_v3, %v430_v0  ;;  %v422_v61 = vadd.f32 %v421_v6, %v420_v1 }
 0x192   : >> { %v423_v5 = vrot.slane %v422_v61, 1  ;;  %v433_v7 = vrot.slane %v432_v60, 1 }
 0x194   : >> { %v424_v8 = vadd.f32 %v423_v5, %v422_v61  ;;  %v434_v9 = vadd.f32 %v433_v7, %v432_v60 }
 0x196   : >> { %687 = vpush %v424_v8 }
 0x197   : >> { %689 = vpush %v434_v9 }
 0x1c7   : >> { %s688_s13 = spop %687 }
 0x1c8   : >> { %s932_s28 = sadd.f32 %s824_s28, %s688_s13   ;;  %s690_s16 = spop %689 }
 0x1c9   : >> { %s935_s27 = sadd.f32 %s820_s27, %s690_s16   ;;  %213 = sbr.rel (!%p211_p5) target bundleno = 29 (0x1d), region = 117 }
 0x1ca   : >> { %s981_s15 = smov %s932_s28 }
 0x1cb   : >> { %s982_s18 = smov %s935_s27  ;;  %s984_s28 = smov %s981_s15 }
 0x1cc   : >> { %s983_s27 = smov %s982_s18  ;;  %s437_s19 = smul.f32 (%p211_p5), 0.00390625, %s981_s15 }
 0x1cd   : > { %s438_s21 = smul.f32 (%p211_p5), 0.00390625, %s982_s18 }
 0x1ce LB: >> { %s681_s24 = sshll.u32 %s836_s23, 3  ;;  %v451_v2 = vstv %s437_s19  ;;  %s444_s23 = sadd.s32 1, %s836_s23   ;;  %s836_s23 = sphi %s950_s23, %s444_s23   ;;  %s832_s22 = sphi %s948_s22, %s985_s22  }
 0x1cf   : >> { %v453_v10 = vstv %s438_s21  ;;  %s447_s17 = scalar_lea.vmem [#allocation4], %s681_s24  ;;  %s449_s20 = scalar_lea.vmem [#allocation5], %s681_s24 }
 0x1d0   : >> { %v448_v11 = vld [vmem:[%s447_s17] sm:$0xff]  ;;  %p441_p6 = scmp.ge.s32.totalorder %s444_s23, 2  }
 0x1d1   : >> { %v450_v12 = vld [vmem:[%s449_s20] sm:$0xff]  ;;  %v452_v13 = vsub.f32 %v448_v11, %v451_v2 }
 0x1d2   : >> { %v454_v14 = vsub.f32 %v450_v12, %v453_v10 }
 0x1d3   : >> { %v455_v15 = vmul.f32 %v452_v13, %v452_v13 }
 0x1d4   : >> { %v456_v16 = vmul.f32 %v454_v14, %v454_v14 }
 0x1d6   : >> { %v457_v17 = vadd.f32 %v456_v16, %v455_v15 }
 0x1d8   : >> { %776 = vrsqrt.f32 %v457_v17  ;;  %vm460_vm14 = vcmp.eq.f32.partialorder %v457_v17, inf  ;;  %v463_v19 = vand.u32 2147483648, %v457_v17  ;;  %vm462_vm15 = vcmp.eq.f32.partialorder %v457_v17, 0.0 }
 0x1e5   : >> { %v777_v18 = vpop.eup %776 }
 0x1e6   : >> { %v459_v20 = vmul.f32 %v777_v18, %v457_v17 }
 0x1e8   : >> { %v461_v21 = vsel %vm460_vm14, %v457_v17, %v459_v20 }
 0x1e9   : >> { %v464_v22 = vsel %vm462_vm15, %v463_v19, %v461_v21 }
 0x1ea   : >> { %v465_v23 = vmul.f32 %v877_v4, %v464_v22 }
 0x1ec   : >> { %466 = vadd.xlane.f32.xlu0 %v465_v23 }
 0x275   : >> { %v467_v24 = vpop.xlane.xlu0 %466 }
 0x276   : >> { %v468_v25 = vrot.slane %v467_v24, 4 }
 0x278   : >> { %v469_v26 = vadd.f32 %v468_v25, %v467_v24 }
 0x27a   : >> { %v470_v27 = vrot.slane %v469_v26, 2 }
 0x27c   : >> { %v471_v28 = vadd.f32 %v470_v27, %v469_v26 }
 0x27e   : >> { %v472_v29 = vrot.slane %v471_v28, 1 }
 0x280   : >> { %v473_v30 = vadd.f32 %v472_v29, %v471_v28 }
 0x282   : >> { %691 = vpush %v473_v30 }
 0x2b2   : > { %443 = sbr.rel (!%p441_p6) target bundleno = 462 (0x1ce), region = 128 }
 0x2b3   : >> { %s692_s25 = spop %691 }
 0x2b4   : >> { %s475_s26 = sadd.f32 %s832_s22, %s692_s25  }
 0x2b6   : >> { %s985_s22 = smov %s475_s26  ;;  %s476_s27 = smul.f32 (%p441_p6), 0.00390625, %s475_s26 }
 0x2b8   : > { %v477_v31 = vstv %s476_s27 }
 0x2b9   : > { %778 = vrsqrt.f32 %v477_v31  ;;  %vm480_vm0 = vcmp.eq.f32.partialorder %v477_v31, inf  ;;  %v483_v33 = vand.u32 2147483648, %v477_v31  ;;  %vm482_vm1 = vcmp.eq.f32.partialorder %v477_v31, 0.0 }
 0x2c6   : > { %v779_v32 = vpop.eup %778 }
 0x2c7   : > { %v479_v34 = vmul.f32 %v779_v32, %v477_v31 }
 0x2c9   : > { %v481_v35 = vsel %vm480_vm0, %v477_v31, %v479_v34 }
 0x2ca   : > { %v484_v36 = vsel %vm482_vm1, %v483_v33, %v481_v35 }
 0x2cb   : > { %693 = vpush %v484_v36 }
 0x2fc   : > { %s694_s28 = spop %693 }
 0x2fd   : > { %v486_v37 = vstv %s694_s28 }
 0x2fe   : > { %780 = vrsqrt.f32 %v486_v37  ;;  %vm489_vm2 = vcmp.eq.f32.partialorder %v486_v37, inf  ;;  %v492_v41 = vand.u32 2147483648, %v486_v37  ;;  %vm491_vm3 = vcmp.eq.f32.partialorder %v486_v37, 0.0 }
 0x30b   : > { %v781_v39 = vpop.eup %780 }
 0x30c   : > { %v488_v40 = vmul.f32 %v781_v39, %v486_v37 }
 0x30e   : > { %v490_v42 = vsel %vm489_vm2, %v486_v37, %v488_v40 }
 0x30f   : > { %v493_v4 = vsel %vm491_vm3, %v492_v41, %v490_v42 }
 0x310   : > { %695 = vpush %v493_v4 }
 0x341   : > { %s696_s29 = spop %695 }
 0x342   : > { %v495_v38 = vstv %s696_s29 }
 0x343   : > { %496 = vst [vmem:[%s159_s14] sm:$0x1] %v495_v38 }
 0x344 PF: > { %s12_s9 = sadd.s32 1, %s812_s9  }
 0x345   : > { %p9_p7 = scmp.ge.s32.totalorder %s12_s9, 4  }
 0x347   :  { %11 = sbr.rel (!%p9_p7) target bundleno = 1 (0x1), region = 139 }

</bundles_post_ra>
